<compile_context>
chip_gen: v5e
topology: v5e:2x2
jax: 0.10.0
libtpu: 0.0.40
codegen_flags: <defaults>
</compile_context>

<pallas_src>
import functools

import jax
import jax.numpy as jnp
from jax.experimental import pallas as pl
from jax.experimental.pallas import tpu as pltpu


def _inverse_affine_kernel(x_ref, a_ref, b_ref, o_ref, *, tile_r):
    # y = x * a + b, where a = exp(-log_scale[row]) and b = -shift[row] * a.
    # a_ref / b_ref hold ALL (padded) rows and stay VMEM-resident; slice the
    # window for the current row tile and broadcast across the lane dim.
    r0 = pl.multiple_of(pl.program_id(0) * tile_r, tile_r)
    a = a_ref[pl.ds(r0, tile_r), :]
    b = b_ref[pl.ds(r0, tile_r), :]
    o_ref[...] = (x_ref[...] * a + b).astype(o_ref.dtype)


def _pick_tiles(rows, cols, itemsize, target_bytes):
    """Pick (tile_r, tile_c) so each x/out block is ~target_bytes.

    tile_c is the full col extent if a minimum-height block fits the budget,
    otherwise the largest multiple of 128 that does.  tile_r fills the rest of
    the budget, rounded to the dtype-aware sublane multiple.
    """
    sub = max(8, 32 // itemsize)        # 8 for f32, 16 for bf16, 32 for int8/fp8
    lane = 128
    if cols * sub * itemsize <= target_bytes:
        tile_c = cols
    else:
        tile_c = max(lane, (target_bytes // (sub * itemsize)) // lane * lane)
    tile_r = max(sub, (target_bytes // (tile_c * itemsize)) // sub * sub)
    tile_r = min(tile_r, pl.cdiv(rows, sub) * sub)
    return tile_r, tile_c


def inverse_forward(x_nchw, log_scale_c, shift_c, context=None, *,
                    target_bytes=4 * 1024 * 1024,
                    min_pallas_bytes=4 * 1024 * 1024):
    """Inverse(transform).forward(x, context) == transform.inverse(x).

    x_nchw:      (B, C, H, W)
    log_scale_c: (C,) float32 parameter of the wrapped affine transform
    shift_c:     (C,) float32 parameter of the wrapped affine transform
    context is accepted for signature parity but unused (elementwise flow).
    """
    del context  # the wrapped affine transform ignores context
    B, C, H, W = x_nchw.shape
    rows = B * C
    cols = H * W
    itemsize = x_nchw.dtype.itemsize

    # Precompute fused per-channel scale/bias (O(C) host-side work, f32).
    inv_scale_c = jnp.exp(-log_scale_c.astype(jnp.float32))     # (C,)
    bias_c = -shift_c.astype(jnp.float32) * inv_scale_c         # (C,)

    # Tiny inputs: a pallas_call launch + per-step overhead dominates; let XLA
    # fuse the plain elementwise expression instead.
    if rows * cols * itemsize < min_pallas_bytes:
        a = inv_scale_c[None, :, None, None]
        b = bias_c[None, :, None, None]
        return (x_nchw * a + b).astype(x_nchw.dtype)

    # Flatten NCHW -> (B*C, H*W); spatial extent on the lane dimension.
    x2d = x_nchw.reshape(rows, cols)

    tile_r, tile_c = _pick_tiles(rows, cols, itemsize, target_bytes)
    grid_r = pl.cdiv(rows, tile_r)
    grid_c = pl.cdiv(cols, tile_c)
    padded_rows = grid_r * tile_r

    # Per-row params, padded so the in-kernel pl.ds row window never runs past
    # the resident (padded_rows, 1) buffers on the last (partial) row tile.
    a_rows = jnp.tile(inv_scale_c, (B,)).reshape(rows, 1)
    b_rows = jnp.tile(bias_c, (B,)).reshape(rows, 1)
    if padded_rows != rows:
        pad = ((0, padded_rows - rows), (0, 0))
        a_rows = jnp.pad(a_rows, pad)
        b_rows = jnp.pad(b_rows, pad)

    block_bytes = tile_r * tile_c * itemsize
    # x + out, each double-buffered, plus the resident f32 params and slack.
    vmem_limit = max(32 * 1024 * 1024,
                     4 * block_bytes + 2 * padded_rows * 4 + (2 << 20))

    cost = pl.CostEstimate(
        flops=2 * rows * cols,
        transcendentals=0,
        bytes_accessed=2 * rows * cols * itemsize + 2 * padded_rows * 4,
    )

    out2d = pl.pallas_call(
        functools.partial(_inverse_affine_kernel, tile_r=tile_r),
        out_shape=jax.ShapeDtypeStruct((rows, cols), x_nchw.dtype),
        grid=(grid_r, grid_c),
        in_specs=[
            pl.BlockSpec((tile_r, tile_c), lambda i, j: (i, j)),
            pl.BlockSpec((padded_rows, 1), lambda i, j: (0, 0)),
            pl.BlockSpec((padded_rows, 1), lambda i, j: (0, 0)),
        ],
        out_specs=pl.BlockSpec((tile_r, tile_c), lambda i, j: (i, j)),
        compiler_params=pltpu.CompilerParams(
            dimension_semantics=("parallel", "parallel"),
            vmem_limit_bytes=vmem_limit,
        ),
        cost_estimate=cost,
    )(x2d, a_rows, b_rows)

    return out2d.reshape(B, C, H, W)


if __name__ == "__main__":
    key = jax.random.PRNGKey(0)
    kx, ks, kb = jax.random.split(key, 3)

    B, C, H, W = 2, 4, 16, 16
    x = jax.random.normal(kx, (B, C, H, W), dtype=jnp.float32)

    # Deterministic parameters of the wrapped affine transform.
    log_scale = 0.1 * jax.random.normal(ks, (C,), dtype=jnp.float32)
    shift = 0.1 * jax.random.normal(kb, (C,), dtype=jnp.float32)

    # Force the Pallas path (the demo array is tiny and would otherwise take
    # the plain-jnp small-input fallback).
    y = inverse_forward(x, log_scale, shift, min_pallas_bytes=0)
    y = jax.block_until_ready(y)

    # Pure-JAX reference of transform.inverse for sanity.
    ref = (x - shift[None, :, None, None]) * jnp.exp(
        -log_scale[None, :, None, None]
    )
    assert y.shape == x.shape and y.dtype == x.dtype
    assert jnp.allclose(y, ref, atol=1e-5, rtol=1e-5)

    print("KERNEL_OK")
</pallas_src>

<mosaic_0001>
module attributes {stable_mosaic.version = 11 : i64} {
  func.func @_inverse_affine_kernel(%arg0: i32, %arg1: i32, %arg2: memref<8x256xf32, #tpu.memory_space<vmem>>, %arg3: memref<8x1xf32, #tpu.memory_space<vmem>>, %arg4: memref<8x1xf32, #tpu.memory_space<vmem>>, %arg5: memref<8x256xf32, #tpu.memory_space<vmem>>) attributes {dimension_semantics = [#tpu.dimension_semantics<parallel>, #tpu.dimension_semantics<parallel>], iteration_bounds = array<i64: 1, 1>, scalar_prefetch = 0 : i64, scratch_operands = 0 : i64, tpu.core_type = #tpu.core_type<tc>, window_params = [{transform_indices = @transform_0, window_bounds = array<i64: 8, 256>}, {pipeline_mode = #tpu.pipeline_mode<synchronous>, transform_indices = @transform_1, window_bounds = array<i64: 8, 1>}, {pipeline_mode = #tpu.pipeline_mode<synchronous>, transform_indices = @transform_2, window_bounds = array<i64: 8, 1>}, {transform_indices = @transform_3, window_bounds = array<i64: 8, 256>}]} {
    %c8_i32 = arith.constant 8 : i32
    %0 = arith.muli %arg0, %c8_i32 : i32
    %1 = tpu.assume_multiple %0, 8 : i32
    %2 = arith.index_cast %1 : i32 to index
    %c0 = arith.constant 0 : index
    %3 = vector.load %arg3[%2, %c0] : memref<8x1xf32, #tpu.memory_space<vmem>>, vector<8x1xf32>
    %4 = arith.index_cast %1 : i32 to index
    %c0_0 = arith.constant 0 : index
    %5 = vector.load %arg4[%4, %c0_0] : memref<8x1xf32, #tpu.memory_space<vmem>>, vector<8x1xf32>
    %c0_1 = arith.constant 0 : index
    %c0_2 = arith.constant 0 : index
    %6 = vector.load %arg2[%c0_1, %c0_2] : memref<8x256xf32, #tpu.memory_space<vmem>>, vector<8x256xf32>
    %7 = vector.broadcast %3 : vector<8x1xf32> to vector<8x256xf32>
    %8 = arith.mulf %6, %7 : vector<8x256xf32>
    %9 = vector.broadcast %5 : vector<8x1xf32> to vector<8x256xf32>
    %10 = arith.addf %8, %9 : vector<8x256xf32>
    %c0_3 = arith.constant 0 : index
    %c0_4 = arith.constant 0 : index
    %11 = vector.load %arg5[%c0_3, %c0_4] : memref<8x256xf32, #tpu.memory_space<vmem>>, vector<8x256xf32>
    tpu.vector_store %arg5[%c0_3, %c0_4], %10 {strides = array<i32>} : memref<8x256xf32, #tpu.memory_space<vmem>>, vector<8x256xf32>,
    return
  }
  func.func @transform_0(%arg0: i32, %arg1: i32) -> (i32, i32) {
    %c0_i32 = arith.constant 0 : i32
    return %arg0, %arg1 : i32, i32
  }
  func.func @transform_1(%arg0: i32, %arg1: i32) -> (i32, i32) {
    %c0_i32 = arith.constant 0 : i32
    %c0_i32_0 = arith.constant 0 : i32
    %c0_i32_1 = arith.constant 0 : i32
    return %c0_i32, %c0_i32_0 : i32, i32
  }
  func.func @transform_2(%arg0: i32, %arg1: i32) -> (i32, i32) {
    %c0_i32 = arith.constant 0 : i32
    %c0_i32_0 = arith.constant 0 : i32
    %c0_i32_1 = arith.constant 0 : i32
    return %c0_i32, %c0_i32_0 : i32, i32
  }
  func.func @transform_3(%arg0: i32, %arg1: i32) -> (i32, i32) {
    %c0_i32 = arith.constant 0 : i32
    return %arg0, %arg1 : i32, i32
  }
}

</mosaic_0001>

<bundles_post_ra>
// kernel: tpu_custom_call.1
= control target key start
LH: loop header
LB: loop body
LE: loop exit
PB: predicated region body
PF: predicated region fallthrough
CT: control target
= control target key end

     0   :  { %v83_v1 = vmov 0   ;;  %s120_s0 = inlined_call_operand.vmem [shape: f32[8,256], index: 0, kind: input, shape index: {}]   ;;  %s121_s1 = inlined_call_operand.vmem [shape: f32[8,1], index: 1, kind: input, shape index: {}]   ;;  %s122_s2 = inlined_call_operand.vmem [shape: f32[8,1], index: 2, kind: input, shape index: {}]   ;;  %s123_s3 = inlined_call_operand.hbm [shape: f32[8,256], index: 3, kind: output, shape index: {}]  }
   0x1   :  { %v17_v0 = vld [vmem:[%s121_s1] sm:$0xff]  ;;  %56 = vset.pattern.permute.xlu0 %v83_v1 }
   0x2   :  { %8 = vsyncpa [#allocation3], 0  ;;  %24 = vperm.xlu0 %56, %v17_v0   ;;  %v19_v2 = vld [vmem:[%s122_s2] sm:$0xff]  ;;  %v21_v5 = vld [vmem:[%s120_s0 + $0x8] sm:$0xff]  ;;  %s84_s1 = smov [#allocation2]   ;;  %s45_s23 = sshll.u32 %s123_s3, 4  ;;  %s46_s23 = int_to_ptr.hbm [resolvable:$true] %s45_s23 }
   0x3   :  { %v20_v4 = vld [vmem:[%s120_s0] sm:$0xff]  ;;  %s43_s20 = sshll.u32 %s84_s1, 4  ;;  %s44_s20 = int_to_ptr.vmem [resolvable:$true] %s43_s20 }
   0xa   :  { %31 = vperm.xlu0 %56, %v19_v2  }
  0x74   :  { %v25_v3 = vpop.permute.xlu0 %24 }
  0x75   :  { %v27_v6 = vmul.f32 %v25_v3, %v20_v4  ;;  %v28_v7 = vmul.f32 %v25_v3, %v21_v5 }
  0x7c   :  { %v32_v8 = vpop.permute.xlu0 %31 }
  0x7d   :  { %v34_v9 = vadd.f32 %v32_v8, %v27_v6  ;;  %v35_v10 = vadd.f32 %v32_v8, %v28_v7 }
  0x7f   :  { %36 = vst [vmem:[#allocation2] sm:$0xff] %v34_v9 }
  0x80   :  { %37 = vst [vmem:[#allocation2 + $0x8] sm:$0xff] %v35_v10 }
  0x81   :  { %48 = dma.vmem_to_hbm [thread:$0]  %s44_s20, 256, %s46_s23, [#allocation3]  }
  0x82   :  { %81 = dma.done.wait [#allocation3], 256  }
  0x83   :  { %82 = vsyncadd [#allocation3], 4294967040 }
  0x84   :  { %53 = vsyncpa [#allocation3], 1 }

</bundles_post_ra>
